<compile_context>
chip_gen: v7x
topology: tpu7x:2x2x1
jax: 0.10.0
libtpu: 0.0.40
codegen_flags: <defaults>
</compile_context>

<pallas_src>
import jax
import jax.numpy as jnp
from jax.experimental import pallas as pl
from jax.experimental.pallas import tpu as pltpu

# ---------------- model configuration (small, consistent with __init__) ------
INPUT_SIZE = 32          # backcast length
OUTPUT_SIZE = 16         # forecast length
BLOCK_NUM = 2
STACK_NUM = 2
LAYER_NUM = 3            # FC layers per block (1 input proj + 2 hidden)
LAYER_SIZE = 64
BATCH = 8

N_BLOCKS = BLOCK_NUM * STACK_NUM
N_HIDDEN = LAYER_NUM - 1
THETA_SIZE = INPUT_SIZE + OUTPUT_SIZE

# weight-slab row layout (per block)
ROW_IN = 0
ROW_HID = INPUT_SIZE
ROW_THETA = INPUT_SIZE + N_HIDDEN * LAYER_SIZE
ROWS_PER_BLOCK = ROW_THETA + LAYER_SIZE
BIAS_ROWS = N_HIDDEN + 2          # [b_in, b_hid_0..b_hid_{H-1}, b_theta]
B_THETA_ROW = N_HIDDEN + 1

# sublane-aligned static slices + theta fits in the padded slab width
assert INPUT_SIZE % 8 == 0 and LAYER_SIZE % 8 == 0
assert THETA_SIZE <= LAYER_SIZE, "theta pad assumes input+output <= layer_size"


# ---------------- Pallas kernel ----------------------------------------------
def nbeats_kernel(x_ref, w_ref, b_ref, fcast_ref):
    # Residuals are kept in ORIGINAL time order; the flip is pre-folded into
    # the packed weights, so no data movement is needed here.
    residuals = x_ref[...]                                     # (TILE_B, INPUT_SIZE)
    tile_b = residuals.shape[0]

    # forecast = x[:, -1:]  (original order), broadcast over the output dim.
    forecast = jnp.broadcast_to(
        residuals[:, INPUT_SIZE - 1:INPUT_SIZE], (tile_b, OUTPUT_SIZE))

    # Unrolled over blocks (sequential residual stacking, as in the ModuleList loop).
    for blk in range(N_BLOCKS):
        # input projection (rows already time-flipped at pack time) + ReLU
        h = jnp.maximum(
            jnp.dot(residuals, w_ref[blk, ROW_IN:ROW_IN + INPUT_SIZE, :],
                    preferred_element_type=jnp.float32)
            + b_ref[blk, 0:1, :], 0.0)                         # (TILE_B, LAYER_SIZE)

        # hidden FC + ReLU layers
        for l in range(N_HIDDEN):
            r0 = ROW_HID + l * LAYER_SIZE
            h = jnp.maximum(
                jnp.dot(h, w_ref[blk, r0:r0 + LAYER_SIZE, :],
                        preferred_element_type=jnp.float32)
                + b_ref[blk, 1 + l:2 + l, :], 0.0)             # (TILE_B, LAYER_SIZE)

        # fused theta linear: columns [0:INPUT_SIZE) = backcast (already
        # re-flipped to original time order), [INPUT_SIZE:THETA_SIZE) = forecast,
        # remaining columns are zero padding.
        theta = (jnp.dot(h, w_ref[blk, ROW_THETA:ROW_THETA + LAYER_SIZE, :],
                         preferred_element_type=jnp.float32)
                 + b_ref[blk, B_THETA_ROW:B_THETA_ROW + 1, :])  # (TILE_B, LAYER_SIZE)

        residuals = residuals - theta[:, :INPUT_SIZE]
        forecast = forecast + theta[:, INPUT_SIZE:THETA_SIZE]

    fcast_ref[...] = forecast


# ---------------- parameter packing (done once, outside the kernel) ----------
def pack_params(raw):
    """Fold the time flip into the weights and pack into two lane-dense slabs."""
    w_in, b_in, w_hid, b_hid, w_back, b_back, w_fore, b_fore = raw

    # Fold flip: residuals stay in original order, so flip w_in rows; backcast
    # must come out in original order, so flip w_back / b_back columns.
    w_in_f = w_in[:, ::-1, :]                                  # (NB, IN, LS)
    w_back_f = w_back[:, :, ::-1]                              # (NB, LS, IN)
    b_back_f = b_back[:, :, ::-1]                              # (NB, 1, IN)

    # Fused theta weight/bias (backcast | forecast), zero-padded to LAYER_SIZE cols.
    pad = LAYER_SIZE - THETA_SIZE
    w_theta = jnp.pad(jnp.concatenate([w_back_f, w_fore], axis=-1),
                      ((0, 0), (0, 0), (0, pad)))              # (NB, LS, LS)
    b_theta = jnp.pad(jnp.concatenate([b_back_f, b_fore], axis=-1),
                      ((0, 0), (0, 0), (0, pad)))              # (NB, 1, LS)

    # Weight slab: [w_in_f ; w_hid_0 ; ... ; w_hid_{H-1} ; w_theta] per block.
    w_hid_flat = w_hid.reshape(N_BLOCKS, N_HIDDEN * LAYER_SIZE, LAYER_SIZE)
    w_slab = jnp.concatenate([w_in_f, w_hid_flat, w_theta], axis=1)
    assert w_slab.shape == (N_BLOCKS, ROWS_PER_BLOCK, LAYER_SIZE)

    # Bias slab: [b_in ; b_hid_0 ; ... ; b_hid_{H-1} ; b_theta] per block.
    b_hid_flat = b_hid.reshape(N_BLOCKS, N_HIDDEN, LAYER_SIZE)
    b_slab = jnp.concatenate(
        [b_in, b_hid_flat, b_theta.reshape(N_BLOCKS, 1, LAYER_SIZE)], axis=1)
    assert b_slab.shape == (N_BLOCKS, BIAS_ROWS, LAYER_SIZE)

    return w_slab.astype(jnp.float32), b_slab.astype(jnp.float32)


# ---------------- wrapper -----------------------------------------------------
def nbeats_forward(x, packed):
    """x: (B, INPUT_SIZE) float32.  Returns forecast (B, OUTPUT_SIZE)."""
    w_slab, b_slab = packed
    batch = x.shape[0]
    tile_b = min(batch, 128)           # fill MXU rows when batch is large
    assert batch % tile_b == 0
    grid = (batch // tile_b,)

    return pl.pallas_call(
        nbeats_kernel,
        out_shape=jax.ShapeDtypeStruct((batch, OUTPUT_SIZE), jnp.float32),
        grid=grid,
        in_specs=[
            pl.BlockSpec((tile_b, INPUT_SIZE), lambda b: (b, 0)),
            # weights/biases: constant index_map -> stay resident across batch tiles
            pl.BlockSpec(w_slab.shape, lambda b: (0, 0, 0)),
            pl.BlockSpec(b_slab.shape, lambda b: (0, 0, 0)),
        ],
        out_specs=pl.BlockSpec((tile_b, OUTPUT_SIZE), lambda b: (b, 0)),
        compiler_params=pltpu.CompilerParams(
            dimension_semantics=("parallel",)),   # batch tiles shard across TCs (v7x)
    )(x, w_slab, b_slab)


# ---------------- pure-JAX reference (mirrors the PyTorch module exactly) ----
def nbeats_ref(x, raw):
    w_in, b_in, w_hid, b_hid, w_back, b_back, w_fore, b_fore = raw
    residuals = x[:, ::-1]                     # x.flip(dims=(1,))
    forecast = x[:, -1:]
    for blk in range(N_BLOCKS):
        h = jax.nn.relu(residuals @ w_in[blk] + b_in[blk, 0])
        for l in range(N_HIDDEN):
            h = jax.nn.relu(h @ w_hid[blk, l] + b_hid[blk, l, 0])
        backcast = h @ w_back[blk] + b_back[blk, 0]
        block_forecast = h @ w_fore[blk] + b_fore[blk, 0]
        residuals = residuals - backcast
        forecast = forecast + block_forecast
    return forecast


# ---------------- deterministic parameter init --------------------------------
def init_raw_params(key):
    ks = jax.random.split(key, 8)
    s = 0.05
    w_in = s * jax.random.normal(ks[0], (N_BLOCKS, INPUT_SIZE, LAYER_SIZE), jnp.float32)
    b_in = s * jax.random.normal(ks[1], (N_BLOCKS, 1, LAYER_SIZE), jnp.float32)
    w_hid = s * jax.random.normal(ks[2], (N_BLOCKS, N_HIDDEN, LAYER_SIZE, LAYER_SIZE), jnp.float32)
    b_hid = s * jax.random.normal(ks[3], (N_BLOCKS, N_HIDDEN, 1, LAYER_SIZE), jnp.float32)
    w_back = s * jax.random.normal(ks[4], (N_BLOCKS, LAYER_SIZE, INPUT_SIZE), jnp.float32)
    b_back = s * jax.random.normal(ks[5], (N_BLOCKS, 1, INPUT_SIZE), jnp.float32)
    w_fore = s * jax.random.normal(ks[6], (N_BLOCKS, LAYER_SIZE, OUTPUT_SIZE), jnp.float32)
    b_fore = s * jax.random.normal(ks[7], (N_BLOCKS, 1, OUTPUT_SIZE), jnp.float32)
    return (w_in, b_in, w_hid, b_hid, w_back, b_back, w_fore, b_fore)


if __name__ == "__main__":
    key = jax.random.PRNGKey(0)
    k_x, k_p = jax.random.split(key)
    x = jax.random.normal(k_x, (BATCH, INPUT_SIZE), jnp.float32)

    raw = init_raw_params(k_p)
    packed = pack_params(raw)

    out = nbeats_forward(x, packed)
    out = jax.block_until_ready(out)

    ref = nbeats_ref(x, raw)
    assert out.shape == (BATCH, OUTPUT_SIZE)
    assert jnp.allclose(out, ref, atol=1e-4, rtol=1e-4), "mismatch vs JAX reference"

    print("KERNEL_OK")
</pallas_src>

<mosaic_0001>
module attributes {stable_mosaic.version = 11 : i64} {
  func.func @nbeats_kernel(%arg0: i32, %arg1: memref<8x32xf32, #tpu.memory_space<vmem>>, %arg2: memref<4x224x64xf32, #tpu.memory_space<vmem>>, %arg3: memref<4x4x64xf32, #tpu.memory_space<vmem>>, %arg4: memref<8x16xf32, #tpu.memory_space<vmem>>) attributes {dimension_semantics = [#tpu.dimension_semantics<parallel>], iteration_bounds = array<i64: 1>, scalar_prefetch = 0 : i64, scratch_operands = 0 : i64, tpu.core_type = #tpu.core_type<tc>, window_params = [{transform_indices = @transform_0, window_bounds = array<i64: 8, 32>}, {pipeline_mode = #tpu.pipeline_mode<synchronous>, transform_indices = @transform_1, window_bounds = array<i64: 4, 224, 64>}, {pipeline_mode = #tpu.pipeline_mode<synchronous>, transform_indices = @transform_2, window_bounds = array<i64: 4, 4, 64>}, {transform_indices = @transform_3, window_bounds = array<i64: 8, 16>}]} {
    %c0 = arith.constant 0 : index
    %c0_0 = arith.constant 0 : index
    %0 = vector.load %arg1[%c0, %c0_0] : memref<8x32xf32, #tpu.memory_space<vmem>>, vector<8x32xf32>
    %1 = vector.extract_strided_slice %0 {offsets = [0, 31], sizes = [8, 1], strides = [1, 1]} : vector<8x32xf32> to vector<8x1xf32>
    %2 = vector.shape_cast %1 : vector<8x1xf32> to vector<8x1xf32>
    %3 = vector.broadcast %2 : vector<8x1xf32> to vector<8x16xf32>
    %c0_1 = arith.constant 0 : index
    %c0_2 = arith.constant 0 : index
    %c0_3 = arith.constant 0 : index
    %4 = vector.load %arg2[%c0_1, %c0_2, %c0_3] : memref<4x224x64xf32, #tpu.memory_space<vmem>>, vector<1x32x64xf32>
    %5 = vector.shape_cast %4 : vector<1x32x64xf32> to vector<32x64xf32>
    %cst = arith.constant dense<0.000000e+00> : vector<8x64xf32>
    %6 = tpu.matmul %0, %5, %cst {dimension_numbers = #tpu.dot_dimension_numbers<[1], [0], [0], [1], [0, 0, 1, 1], [], []>} : vector<8x32xf32>, vector<32x64xf32>, vector<8x64xf32> -> vector<8x64xf32>
    %c0_4 = arith.constant 0 : index
    %c0_5 = arith.constant 0 : index
    %c0_6 = arith.constant 0 : index
    %7 = vector.load %arg3[%c0_4, %c0_5, %c0_6] : memref<4x4x64xf32, #tpu.memory_space<vmem>>, vector<1x1x64xf32>
    %8 = vector.shape_cast %7 : vector<1x1x64xf32> to vector<1x64xf32>
    %9 = vector.broadcast %8 : vector<1x64xf32> to vector<8x64xf32>
    %10 = arith.addf %6, %9 : vector<8x64xf32>
    %cst_7 = arith.constant 0.000000e+00 : f32
    %11 = vector.broadcast %cst_7 : f32 to vector<8x64xf32>
    %12 = arith.maximumf %10, %11 : vector<8x64xf32>
    %c0_8 = arith.constant 0 : index
    %c32 = arith.constant 32 : index
    %c0_9 = arith.constant 0 : index
    %13 = vector.load %arg2[%c0_8, %c32, %c0_9] : memref<4x224x64xf32, #tpu.memory_space<vmem>>, vector<1x64x64xf32>
    %14 = vector.shape_cast %13 : vector<1x64x64xf32> to vector<64x64xf32>
    %cst_10 = arith.constant dense<0.000000e+00> : vector<8x64xf32>
    %15 = tpu.matmul %12, %14, %cst_10 {dimension_numbers = #tpu.dot_dimension_numbers<[1], [0], [0], [1], [0, 0, 1, 1], [], []>} : vector<8x64xf32>, vector<64x64xf32>, vector<8x64xf32> -> vector<8x64xf32>
    %c0_11 = arith.constant 0 : index
    %c1 = arith.constant 1 : index
    %c0_12 = arith.constant 0 : index
    %16 = vector.load %arg3[%c0_11, %c1, %c0_12] : memref<4x4x64xf32, #tpu.memory_space<vmem>>, vector<1x1x64xf32>
    %17 = vector.shape_cast %16 : vector<1x1x64xf32> to vector<1x64xf32>
    %18 = vector.broadcast %17 : vector<1x64xf32> to vector<8x64xf32>
    %19 = arith.addf %15, %18 : vector<8x64xf32>
    %cst_13 = arith.constant 0.000000e+00 : f32
    %20 = vector.broadcast %cst_13 : f32 to vector<8x64xf32>
    %21 = arith.maximumf %19, %20 : vector<8x64xf32>
    %c0_14 = arith.constant 0 : index
    %c96 = arith.constant 96 : index
    %c0_15 = arith.constant 0 : index
    %22 = vector.load %arg2[%c0_14, %c96, %c0_15] : memref<4x224x64xf32, #tpu.memory_space<vmem>>, vector<1x64x64xf32>
    %23 = vector.shape_cast %22 : vector<1x64x64xf32> to vector<64x64xf32>
    %cst_16 = arith.constant dense<0.000000e+00> : vector<8x64xf32>
    %24 = tpu.matmul %21, %23, %cst_16 {dimension_numbers = #tpu.dot_dimension_numbers<[1], [0], [0], [1], [0, 0, 1, 1], [], []>} : vector<8x64xf32>, vector<64x64xf32>, vector<8x64xf32> -> vector<8x64xf32>
    %c0_17 = arith.constant 0 : index
    %c2 = arith.constant 2 : index
    %c0_18 = arith.constant 0 : index
    %25 = vector.load %arg3[%c0_17, %c2, %c0_18] : memref<4x4x64xf32, #tpu.memory_space<vmem>>, vector<1x1x64xf32>
    %26 = vector.shape_cast %25 : vector<1x1x64xf32> to vector<1x64xf32>
    %27 = vector.broadcast %26 : vector<1x64xf32> to vector<8x64xf32>
    %28 = arith.addf %24, %27 : vector<8x64xf32>
    %cst_19 = arith.constant 0.000000e+00 : f32
    %29 = vector.broadcast %cst_19 : f32 to vector<8x64xf32>
    %30 = arith.maximumf %28, %29 : vector<8x64xf32>
    %c0_20 = arith.constant 0 : index
    %c160 = arith.constant 160 : index
    %c0_21 = arith.constant 0 : index
    %31 = vector.load %arg2[%c0_20, %c160, %c0_21] : memref<4x224x64xf32, #tpu.memory_space<vmem>>, vector<1x64x64xf32>
    %32 = vector.shape_cast %31 : vector<1x64x64xf32> to vector<64x64xf32>
    %cst_22 = arith.constant dense<0.000000e+00> : vector<8x64xf32>
    %33 = tpu.matmul %30, %32, %cst_22 {dimension_numbers = #tpu.dot_dimension_numbers<[1], [0], [0], [1], [0, 0, 1, 1], [], []>} : vector<8x64xf32>, vector<64x64xf32>, vector<8x64xf32> -> vector<8x64xf32>
    %c0_23 = arith.constant 0 : index
    %c3 = arith.constant 3 : index
    %c0_24 = arith.constant 0 : index
    %34 = vector.load %arg3[%c0_23, %c3, %c0_24] : memref<4x4x64xf32, #tpu.memory_space<vmem>>, vector<1x1x64xf32>
    %35 = vector.shape_cast %34 : vector<1x1x64xf32> to vector<1x64xf32>
    %36 = vector.broadcast %35 : vector<1x64xf32> to vector<8x64xf32>
    %37 = arith.addf %33, %36 : vector<8x64xf32>
    %38 = vector.extract_strided_slice %37 {offsets = [0, 0], sizes = [8, 32], strides = [1, 1]} : vector<8x64xf32> to vector<8x32xf32>
    %39 = arith.subf %0, %38 : vector<8x32xf32>
    %40 = vector.extract_strided_slice %37 {offsets = [0, 32], sizes = [8, 16], strides = [1, 1]} : vector<8x64xf32> to vector<8x16xf32>
    %41 = arith.addf %3, %40 : vector<8x16xf32>
    %c1_25 = arith.constant 1 : index
    %c0_26 = arith.constant 0 : index
    %c0_27 = arith.constant 0 : index
    %42 = vector.load %arg2[%c1_25, %c0_26, %c0_27] : memref<4x224x64xf32, #tpu.memory_space<vmem>>, vector<1x32x64xf32>
    %43 = vector.shape_cast %42 : vector<1x32x64xf32> to vector<32x64xf32>
    %cst_28 = arith.constant dense<0.000000e+00> : vector<8x64xf32>
    %44 = tpu.matmul %39, %43, %cst_28 {dimension_numbers = #tpu.dot_dimension_numbers<[1], [0], [0], [1], [0, 0, 1, 1], [], []>} : vector<8x32xf32>, vector<32x64xf32>, vector<8x64xf32> -> vector<8x64xf32>
    %c1_29 = arith.constant 1 : index
    %c0_30 = arith.constant 0 : index
    %c0_31 = arith.constant 0 : index
    %45 = vector.load %arg3[%c1_29, %c0_30, %c0_31] : memref<4x4x64xf32, #tpu.memory_space<vmem>>, vector<1x1x64xf32>
    %46 = vector.shape_cast %45 : vector<1x1x64xf32> to vector<1x64xf32>
    %47 = vector.broadcast %46 : vector<1x64xf32> to vector<8x64xf32>
    %48 = arith.addf %44, %47 : vector<8x64xf32>
    %cst_32 = arith.constant 0.000000e+00 : f32
    %49 = vector.broadcast %cst_32 : f32 to vector<8x64xf32>
    %50 = arith.maximumf %48, %49 : vector<8x64xf32>
    %c1_33 = arith.constant 1 : index
    %c32_34 = arith.constant 32 : index
    %c0_35 = arith.constant 0 : index
    %51 = vector.load %arg2[%c1_33, %c32_34, %c0_35] : memref<4x224x64xf32, #tpu.memory_space<vmem>>, vector<1x64x64xf32>
    %52 = vector.shape_cast %51 : vector<1x64x64xf32> to vector<64x64xf32>
    %cst_36 = arith.constant dense<0.000000e+00> : vector<8x64xf32>
    %53 = tpu.matmul %50, %52, %cst_36 {dimension_numbers = #tpu.dot_dimension_numbers<[1], [0], [0], [1], [0, 0, 1, 1], [], []>} : vector<8x64xf32>, vector<64x64xf32>, vector<8x64xf32> -> vector<8x64xf32>
    %c1_37 = arith.constant 1 : index
    %c1_38 = arith.constant 1 : index
    %c0_39 = arith.constant 0 : index
    %54 = vector.load %arg3[%c1_37, %c1_38, %c0_39] : memref<4x4x64xf32, #tpu.memory_space<vmem>>, vector<1x1x64xf32>
    %55 = vector.shape_cast %54 : vector<1x1x64xf32> to vector<1x64xf32>
    %56 = vector.broadcast %55 : vector<1x64xf32> to vector<8x64xf32>
    %57 = arith.addf %53, %56 : vector<8x64xf32>
    %cst_40 = arith.constant 0.000000e+00 : f32
    %58 = vector.broadcast %cst_40 : f32 to vector<8x64xf32>
    %59 = arith.maximumf %57, %58 : vector<8x64xf32>
    %c1_41 = arith.constant 1 : index
    %c96_42 = arith.constant 96 : index
    %c0_43 = arith.constant 0 : index
    %60 = vector.load %arg2[%c1_41, %c96_42, %c0_43] : memref<4x224x64xf32, #tpu.memory_space<vmem>>, vector<1x64x64xf32>
    %61 = vector.shape_cast %60 : vector<1x64x64xf32> to vector<64x64xf32>
    %cst_44 = arith.constant dense<0.000000e+00> : vector<8x64xf32>
    %62 = tpu.matmul %59, %61, %cst_44 {dimension_numbers = #tpu.dot_dimension_numbers<[1], [0], [0], [1], [0, 0, 1, 1], [], []>} : vector<8x64xf32>, vector<64x64xf32>, vector<8x64xf32> -> vector<8x64xf32>
    %c1_45 = arith.constant 1 : index
    %c2_46 = arith.constant 2 : index
    %c0_47 = arith.constant 0 : index
    %63 = vector.load %arg3[%c1_45, %c2_46, %c0_47] : memref<4x4x64xf32, #tpu.memory_space<vmem>>, vector<1x1x64xf32>
    %64 = vector.shape_cast %63 : vector<1x1x64xf32> to vector<1x64xf32>
    %65 = vector.broadcast %64 : vector<1x64xf32> to vector<8x64xf32>
    %66 = arith.addf %62, %65 : vector<8x64xf32>
    %cst_48 = arith.constant 0.000000e+00 : f32
    %67 = vector.broadcast %cst_48 : f32 to vector<8x64xf32>
    %68 = arith.maximumf %66, %67 : vector<8x64xf32>
    %c1_49 = arith.constant 1 : index
    %c160_50 = arith.constant 160 : index
    %c0_51 = arith.constant 0 : index
    %69 = vector.load %arg2[%c1_49, %c160_50, %c0_51] : memref<4x224x64xf32, #tpu.memory_space<vmem>>, vector<1x64x64xf32>
    %70 = vector.shape_cast %69 : vector<1x64x64xf32> to vector<64x64xf32>
    %cst_52 = arith.constant dense<0.000000e+00> : vector<8x64xf32>
    %71 = tpu.matmul %68, %70, %cst_52 {dimension_numbers = #tpu.dot_dimension_numbers<[1], [0], [0], [1], [0, 0, 1, 1], [], []>} : vector<8x64xf32>, vector<64x64xf32>, vector<8x64xf32> -> vector<8x64xf32>
    %c1_53 = arith.constant 1 : index
    %c3_54 = arith.constant 3 : index
    %c0_55 = arith.constant 0 : index
    %72 = vector.load %arg3[%c1_53, %c3_54, %c0_55] : memref<4x4x64xf32, #tpu.memory_space<vmem>>, vector<1x1x64xf32>
    %73 = vector.shape_cast %72 : vector<1x1x64xf32> to vector<1x64xf32>
    %74 = vector.broadcast %73 : vector<1x64xf32> to vector<8x64xf32>
    %75 = arith.addf %71, %74 : vector<8x64xf32>
    %76 = vector.extract_strided_slice %75 {offsets = [0, 0], sizes = [8, 32], strides = [1, 1]} : vector<8x64xf32> to vector<8x32xf32>
    %77 = arith.subf %39, %76 : vector<8x32xf32>
    %78 = vector.extract_strided_slice %75 {offsets = [0, 32], sizes = [8, 16], strides = [1, 1]} : vector<8x64xf32> to vector<8x16xf32>
    %79 = arith.addf %41, %78 : vector<8x16xf32>
    %c2_56 = arith.constant 2 : index
    %c0_57 = arith.constant 0 : index
    %c0_58 = arith.constant 0 : index
    %80 = vector.load %arg2[%c2_56, %c0_57, %c0_58] : memref<4x224x64xf32, #tpu.memory_space<vmem>>, vector<1x32x64xf32>
    %81 = vector.shape_cast %80 : vector<1x32x64xf32> to vector<32x64xf32>
    %cst_59 = arith.constant dense<0.000000e+00> : vector<8x64xf32>
    %82 = tpu.matmul %77, %81, %cst_59 {dimension_numbers = #tpu.dot_dimension_numbers<[1], [0], [0], [1], [0, 0, 1, 1], [], []>} : vector<8x32xf32>, vector<32x64xf32>, vector<8x64xf32> -> vector<8x64xf32>
    %c2_60 = arith.constant 2 : index
    %c0_61 = arith.constant 0 : index
    %c0_62 = arith.constant 0 : index
    %83 = vector.load %arg3[%c2_60, %c0_61, %c0_62] : memref<4x4x64xf32, #tpu.memory_space<vmem>>, vector<1x1x64xf32>
    %84 = vector.shape_cast %83 : vector<1x1x64xf32> to vector<1x64xf32>
    %85 = vector.broadcast %84 : vector<1x64xf32> to vector<8x64xf32>
    %86 = arith.addf %82, %85 : vector<8x64xf32>
    %cst_63 = arith.constant 0.000000e+00 : f32
    %87 = vector.broadcast %cst_63 : f32 to vector<8x64xf32>
    %88 = arith.maximumf %86, %87 : vector<8x64xf32>
    %c2_64 = arith.constant 2 : index
    %c32_65 = arith.constant 32 : index
    %c0_66 = arith.constant 0 : index
    %89 = vector.load %arg2[%c2_64, %c32_65, %c0_66] : memref<4x224x64xf32, #tpu.memory_space<vmem>>, vector<1x64x64xf32>
    %90 = vector.shape_cast %89 : vector<1x64x64xf32> to vector<64x64xf32>
    %cst_67 = arith.constant dense<0.000000e+00> : vector<8x64xf32>
    %91 = tpu.matmul %88, %90, %cst_67 {dimension_numbers = #tpu.dot_dimension_numbers<[1], [0], [0], [1], [0, 0, 1, 1], [], []>} : vector<8x64xf32>, vector<64x64xf32>, vector<8x64xf32> -> vector<8x64xf32>
    %c2_68 = arith.constant 2 : index
    %c1_69 = arith.constant 1 : index
    %c0_70 = arith.constant 0 : index
    %92 = vector.load %arg3[%c2_68, %c1_69, %c0_70] : memref<4x4x64xf32, #tpu.memory_space<vmem>>, vector<1x1x64xf32>
    %93 = vector.shape_cast %92 : vector<1x1x64xf32> to vector<1x64xf32>
    %94 = vector.broadcast %93 : vector<1x64xf32> to vector<8x64xf32>
    %95 = arith.addf %91, %94 : vector<8x64xf32>
    %cst_71 = arith.constant 0.000000e+00 : f32
    %96 = vector.broadcast %cst_71 : f32 to vector<8x64xf32>
    %97 = arith.maximumf %95, %96 : vector<8x64xf32>
    %c2_72 = arith.constant 2 : index
    %c96_73 = arith.constant 96 : index
    %c0_74 = arith.constant 0 : index
    %98 = vector.load %arg2[%c2_72, %c96_73, %c0_74] : memref<4x224x64xf32, #tpu.memory_space<vmem>>, vector<1x64x64xf32>
    %99 = vector.shape_cast %98 : vector<1x64x64xf32> to vector<64x64xf32>
    %cst_75 = arith.constant dense<0.000000e+00> : vector<8x64xf32>
    %100 = tpu.matmul %97, %99, %cst_75 {dimension_numbers = #tpu.dot_dimension_numbers<[1], [0], [0], [1], [0, 0, 1, 1], [], []>} : vector<8x64xf32>, vector<64x64xf32>, vector<8x64xf32> -> vector<8x64xf32>
    %c2_76 = arith.constant 2 : index
    %c2_77 = arith.constant 2 : index
    %c0_78 = arith.constant 0 : index
    %101 = vector.load %arg3[%c2_76, %c2_77, %c0_78] : memref<4x4x64xf32, #tpu.memory_space<vmem>>, vector<1x1x64xf32>
    %102 = vector.shape_cast %101 : vector<1x1x64xf32> to vector<1x64xf32>
    %103 = vector.broadcast %102 : vector<1x64xf32> to vector<8x64xf32>
    %104 = arith.addf %100, %103 : vector<8x64xf32>
    %cst_79 = arith.constant 0.000000e+00 : f32
    %105 = vector.broadcast %cst_79 : f32 to vector<8x64xf32>
    %106 = arith.maximumf %104, %105 : vector<8x64xf32>
    %c2_80 = arith.constant 2 : index
    %c160_81 = arith.constant 160 : index
    %c0_82 = arith.constant 0 : index
    %107 = vector.load %arg2[%c2_80, %c160_81, %c0_82] : memref<4x224x64xf32, #tpu.memory_space<vmem>>, vector<1x64x64xf32>
    %108 = vector.shape_cast %107 : vector<1x64x64xf32> to vector<64x64xf32>
    %cst_83 = arith.constant dense<0.000000e+00> : vector<8x64xf32>
    %109 = tpu.matmul %106, %108, %cst_83 {dimension_numbers = #tpu.dot_dimension_numbers<[1], [0], [0], [1], [0, 0, 1, 1], [], []>} : vector<8x64xf32>, vector<64x64xf32>, vector<8x64xf32> -> vector<8x64xf32>
    %c2_84 = arith.constant 2 : index
    %c3_85 = arith.constant 3 : index
    %c0_86 = arith.constant 0 : index
    %110 = vector.load %arg3[%c2_84, %c3_85, %c0_86] : memref<4x4x64xf32, #tpu.memory_space<vmem>>, vector<1x1x64xf32>
    %111 = vector.shape_cast %110 : vector<1x1x64xf32> to vector<1x64xf32>
    %112 = vector.broadcast %111 : vector<1x64xf32> to vector<8x64xf32>
    %113 = arith.addf %109, %112 : vector<8x64xf32>
    %114 = vector.extract_strided_slice %113 {offsets = [0, 0], sizes = [8, 32], strides = [1, 1]} : vector<8x64xf32> to vector<8x32xf32>
    %115 = arith.subf %77, %114 : vector<8x32xf32>
    %116 = vector.extract_strided_slice %113 {offsets = [0, 32], sizes = [8, 16], strides = [1, 1]} : vector<8x64xf32> to vector<8x16xf32>
    %117 = arith.addf %79, %116 : vector<8x16xf32>
    %c3_87 = arith.constant 3 : index
    %c0_88 = arith.constant 0 : index
    %c0_89 = arith.constant 0 : index
    %118 = vector.load %arg2[%c3_87, %c0_88, %c0_89] : memref<4x224x64xf32, #tpu.memory_space<vmem>>, vector<1x32x64xf32>
    %119 = vector.shape_cast %118 : vector<1x32x64xf32> to vector<32x64xf32>
    %cst_90 = arith.constant dense<0.000000e+00> : vector<8x64xf32>
    %120 = tpu.matmul %115, %119, %cst_90 {dimension_numbers = #tpu.dot_dimension_numbers<[1], [0], [0], [1], [0, 0, 1, 1], [], []>} : vector<8x32xf32>, vector<32x64xf32>, vector<8x64xf32> -> vector<8x64xf32>
    %c3_91 = arith.constant 3 : index
    %c0_92 = arith.constant 0 : index
    %c0_93 = arith.constant 0 : index
    %121 = vector.load %arg3[%c3_91, %c0_92, %c0_93] : memref<4x4x64xf32, #tpu.memory_space<vmem>>, vector<1x1x64xf32>
    %122 = vector.shape_cast %121 : vector<1x1x64xf32> to vector<1x64xf32>
    %123 = vector.broadcast %122 : vector<1x64xf32> to vector<8x64xf32>
    %124 = arith.addf %120, %123 : vector<8x64xf32>
    %cst_94 = arith.constant 0.000000e+00 : f32
    %125 = vector.broadcast %cst_94 : f32 to vector<8x64xf32>
    %126 = arith.maximumf %124, %125 : vector<8x64xf32>
    %c3_95 = arith.constant 3 : index
    %c32_96 = arith.constant 32 : index
    %c0_97 = arith.constant 0 : index
    %127 = vector.load %arg2[%c3_95, %c32_96, %c0_97] : memref<4x224x64xf32, #tpu.memory_space<vmem>>, vector<1x64x64xf32>
    %128 = vector.shape_cast %127 : vector<1x64x64xf32> to vector<64x64xf32>
    %cst_98 = arith.constant dense<0.000000e+00> : vector<8x64xf32>
    %129 = tpu.matmul %126, %128, %cst_98 {dimension_numbers = #tpu.dot_dimension_numbers<[1], [0], [0], [1], [0, 0, 1, 1], [], []>} : vector<8x64xf32>, vector<64x64xf32>, vector<8x64xf32> -> vector<8x64xf32>
    %c3_99 = arith.constant 3 : index
    %c1_100 = arith.constant 1 : index
    %c0_101 = arith.constant 0 : index
    %130 = vector.load %arg3[%c3_99, %c1_100, %c0_101] : memref<4x4x64xf32, #tpu.memory_space<vmem>>, vector<1x1x64xf32>
    %131 = vector.shape_cast %130 : vector<1x1x64xf32> to vector<1x64xf32>
    %132 = vector.broadcast %131 : vector<1x64xf32> to vector<8x64xf32>
    %133 = arith.addf %129, %132 : vector<8x64xf32>
    %cst_102 = arith.constant 0.000000e+00 : f32
    %134 = vector.broadcast %cst_102 : f32 to vector<8x64xf32>
    %135 = arith.maximumf %133, %134 : vector<8x64xf32>
    %c3_103 = arith.constant 3 : index
    %c96_104 = arith.constant 96 : index
    %c0_105 = arith.constant 0 : index
    %136 = vector.load %arg2[%c3_103, %c96_104, %c0_105] : memref<4x224x64xf32, #tpu.memory_space<vmem>>, vector<1x64x64xf32>
    %137 = vector.shape_cast %136 : vector<1x64x64xf32> to vector<64x64xf32>
    %cst_106 = arith.constant dense<0.000000e+00> : vector<8x64xf32>
    %138 = tpu.matmul %135, %137, %cst_106 {dimension_numbers = #tpu.dot_dimension_numbers<[1], [0], [0], [1], [0, 0, 1, 1], [], []>} : vector<8x64xf32>, vector<64x64xf32>, vector<8x64xf32> -> vector<8x64xf32>
    %c3_107 = arith.constant 3 : index
    %c2_108 = arith.constant 2 : index
    %c0_109 = arith.constant 0 : index
    %139 = vector.load %arg3[%c3_107, %c2_108, %c0_109] : memref<4x4x64xf32, #tpu.memory_space<vmem>>, vector<1x1x64xf32>
    %140 = vector.shape_cast %139 : vector<1x1x64xf32> to vector<1x64xf32>
    %141 = vector.broadcast %140 : vector<1x64xf32> to vector<8x64xf32>
    %142 = arith.addf %138, %141 : vector<8x64xf32>
    %cst_110 = arith.constant 0.000000e+00 : f32
    %143 = vector.broadcast %cst_110 : f32 to vector<8x64xf32>
    %144 = arith.maximumf %142, %143 : vector<8x64xf32>
    %c3_111 = arith.constant 3 : index
    %c160_112 = arith.constant 160 : index
    %c0_113 = arith.constant 0 : index
    %145 = vector.load %arg2[%c3_111, %c160_112, %c0_113] : memref<4x224x64xf32, #tpu.memory_space<vmem>>, vector<1x64x64xf32>
    %146 = vector.shape_cast %145 : vector<1x64x64xf32> to vector<64x64xf32>
    %cst_114 = arith.constant dense<0.000000e+00> : vector<8x64xf32>
    %147 = tpu.matmul %144, %146, %cst_114 {dimension_numbers = #tpu.dot_dimension_numbers<[1], [0], [0], [1], [0, 0, 1, 1], [], []>} : vector<8x64xf32>, vector<64x64xf32>, vector<8x64xf32> -> vector<8x64xf32>
    %c3_115 = arith.constant 3 : index
    %c3_116 = arith.constant 3 : index
    %c0_117 = arith.constant 0 : index
    %148 = vector.load %arg3[%c3_115, %c3_116, %c0_117] : memref<4x4x64xf32, #tpu.memory_space<vmem>>, vector<1x1x64xf32>
    %149 = vector.shape_cast %148 : vector<1x1x64xf32> to vector<1x64xf32>
    %150 = vector.broadcast %149 : vector<1x64xf32> to vector<8x64xf32>
    %151 = arith.addf %147, %150 : vector<8x64xf32>
    %152 = vector.extract_strided_slice %151 {offsets = [0, 32], sizes = [8, 16], strides = [1, 1]} : vector<8x64xf32> to vector<8x16xf32>
    %153 = arith.addf %117, %152 : vector<8x16xf32>
    %c0_118 = arith.constant 0 : index
    %c0_119 = arith.constant 0 : index
    %154 = vector.load %arg4[%c0_118, %c0_119] : memref<8x16xf32, #tpu.memory_space<vmem>>, vector<8x16xf32>
    tpu.vector_store %arg4[%c0_118, %c0_119], %153 {strides = array<i32>} : memref<8x16xf32, #tpu.memory_space<vmem>>, vector<8x16xf32>,
    return
  }
  func.func @transform_0(%arg0: i32) -> (i32, i32) {
    %c0_i32 = arith.constant 0 : i32
    %c0_i32_0 = arith.constant 0 : i32
    return %arg0, %c0_i32 : i32, i32
  }
  func.func @transform_1(%arg0: i32) -> (i32, i32, i32) {
    %c0_i32 = arith.constant 0 : i32
    %c0_i32_0 = arith.constant 0 : i32
    %c0_i32_1 = arith.constant 0 : i32
    %c0_i32_2 = arith.constant 0 : i32
    return %c0_i32, %c0_i32_0, %c0_i32_1 : i32, i32, i32
  }
  func.func @transform_2(%arg0: i32) -> (i32, i32, i32) {
    %c0_i32 = arith.constant 0 : i32
    %c0_i32_0 = arith.constant 0 : i32
    %c0_i32_1 = arith.constant 0 : i32
    %c0_i32_2 = arith.constant 0 : i32
    return %c0_i32, %c0_i32_0, %c0_i32_1 : i32, i32, i32
  }
  func.func @transform_3(%arg0: i32) -> (i32, i32) {
    %c0_i32 = arith.constant 0 : i32
    %c0_i32_0 = arith.constant 0 : i32
    return %arg0, %c0_i32 : i32, i32
  }
}

</mosaic_0001>

<bundles_post_ra>
// kernel: tpu_custom_call.1
= control target key start
LH: loop header
LB: loop body
LE: loop exit
PB: predicated region body
PF: predicated region fallthrough
CT: control target
= control target key end

     0   :  { %v2154_v3 = vmov 0.0|0.0   ;;  %vm2155_vm0 = vmmov 0   ;;  %v2156_v6 = vmov 0.0   ;;  %s2706_s0 = inlined_call_operand.vmem [shape: f32[8,32], index: 0, kind: input, shape index: {}]   ;;  %s2707_s1 = inlined_call_operand.vmem [shape: f32[4,224,64], index: 1, kind: input, shape index: {}]   ;;  %s2708_s2 = inlined_call_operand.vmem [shape: f32[4,4,64], index: 2, kind: input, shape index: {}]   ;;  %s2709_s3 = inlined_call_operand.hbm [shape: f32[8,16], index: 3, kind: output, shape index: {}]  }
   0x1   :  { %v21_v0 = vld [vmem:[%s2707_s1] sm:$0xff]  ;;  %v22_v1 = vld [vmem:[%s2707_s1 + $0x8] sm:$0xff]  ;;  %v23_v2 = vld [vmem:[%s2707_s1 + $0x10] sm:$0xff]  ;;  %1955 = vmatprep.subr.bf16.mxu1 %v2154_v3  ;;  %1691 = vmatprep.mubr.msk.f32.mxu1 %vm2155_vm0, %v2156_v6 }
   0x2   :  { %v1956_v4 = vpack.c.bf16 %v22_v1, %v21_v0  ;;  %v24_v5 = vld [vmem:[%s2707_s1 + $0x18] sm:$0xff]  ;;  %1973 = vmatprep.subr.bf16.mxu0 %v2154_v3  ;;  %1729 = vmatprep.mubr.msk.f32.mxu0 %vm2155_vm0, %v2156_v6  ;;  %v104_v8 = vld [vmem:[%s2707_s1 + $0x20] sm:$0xff]  ;;  %v105_v9 = vld [vmem:[%s2707_s1 + $0x28] sm:$0xff] }
   0x3   :  { %v1959_v7 = vpack.c.bf16 %v24_v5, %v23_v2 }
   0x4   :  { %1957 = vmatpush3.bf16.msra.mxu1 %v1956_v4 }
   0x5   :  { %1958 = vmatprep.subr.bf16.mxu1 %v2154_v3 }
   0x6   :  { %8 = vsyncpa [#allocation3], 0  ;;  %v2208_v10 = vld [vmem:[%s2706_s0] sm:$0xff]  ;;  %vm30_vm1 = vcmask 261120   ;;  %v1962_v11 = vpack.c.bf16 %v105_v9, %v104_v8  ;;  %v106_v12 = vld [vmem:[%s2707_s1 + $0x30] sm:$0xff]  ;;  %vm117_vm2 = vcmask 523264  }
   0x7   :  { %v107_v13 = vld [vmem:[%s2707_s1 + $0x38] sm:$0xff]  ;;  %v108_v15 = vld [vmem:[%s2707_s1 + $0x40] sm:$0xff]  ;;  %v109_v16 = vld [vmem:[%s2707_s1 + $0x48] sm:$0xff]  ;;  %v2157_v57 = vmov 31   ;;  %s2159_s18 = smov [#allocation2]   ;;  %vm1411_vm3 = vcmask 130048  }
   0x8   :  { %1960 = vmatpush3.bf16.msra.mxu1 %v1959_v7  ;;  %v1965_v14 = vpack.c.bf16 %v107_v13, %v106_v12  ;;  %v1968_v17 = vpack.c.bf16 %v109_v16, %v108_v15  ;;  %v110_v18 = vld [vmem:[%s2707_s1 + $0x50] sm:$0xff]  ;;  %v111_v19 = vld [vmem:[%s2707_s1 + $0x58] sm:$0xff]  ;;  %v192_v21 = vld [vmem:[%s2707_s1 + $0x60] sm:$0xff]  ;;  %2129 = vset.pattern.permute.xlu0 %v2157_v57  ;;  %s1419_s19 = sshll.u32 %s2159_s18, 4  ;;  %s1420_s19 = int_to_ptr.vmem [resolvable:$true] %s1419_s19 }
   0x9   :  { %1961 = vmatprep.subr.bf16.mxu1 %v2154_v3  ;;  %v1971_v20 = vpack.c.bf16 %v111_v19, %v110_v18  ;;  %v193_v22 = vld [vmem:[%s2707_s1 + $0x68] sm:$0xff]  ;;  %v194_v23 = vld [vmem:[%s2707_s1 + $0x70] sm:$0xff]  ;;  %v195_v25 = vld [vmem:[%s2707_s1 + $0x78] sm:$0xff]  ;;  %18 = vperm.xlu0 %2129, %v2208_v10   ;;  %s2130_s20 = scalar_lea.vmem %s1420_s19, 128  ;;  %p2135_p1 = scmp.lt.s32.totalorder %s1420_s19, %s1420_s19 }
   0xa   :  { %v1974_v24 = vpack.c.bf16 %v193_v22, %v192_v21  ;;  %v1977_v26 = vpack.c.bf16 %v195_v25, %v194_v23  ;;  %v196_v27 = vld [vmem:[%s2707_s1 + $0x80] sm:$0xff]  ;;  %v197_v28 = vld [vmem:[%s2707_s1 + $0x88] sm:$0xff]  ;;  %v198_v35 = vld [vmem:[%s2707_s1 + $0x90] sm:$0xff]  ;;  %p2131_p0 = scmp.ne.s32.totalorder %s1420_s19, %s2130_s20  ;;  %p2136_p2 = scmp.lt.s32.totalorder %s2130_s20, %s2130_s20 }
   0xb   :  { %1692 = vmatmul.mubr.msk.f32.vlgmr.msra.gmra.mrb[0].mxu1 %vm30_vm1, %v2208_v10  ;;  %v1980_v29 = vpack.c.bf16 %v197_v28, %v196_v27  ;;  %v1427_v30 = vld [vmem:[%s2708_s2] ss:$0 sm:$0xff]  ;;  %v199_v36 = vld [vmem:[%s2707_s1 + $0x98] sm:$0xff]  ;;  %v280_v39 = vld [vmem:[%s2707_s1 + $0xa8] sm:$0xff] }
   0xc   :  { %1963 = vmatpush3.bf16.msra.mxu1 %v1962_v11  ;;  %1710 = vmatprep.mubr.msk.f32.mxu1 %vm2155_vm0, %v2156_v6  ;;  %v1983_v37 = vpack.c.bf16 %v199_v36, %v198_v35  ;;  %v279_v38 = vld [vmem:[%s2707_s1 + $0xa0] sm:$0xff]  ;;  %v281_v40 = vld [vmem:[%s2707_s1 + $0xb0] sm:$0xff]  ;;  %v282_v42 = vld [vmem:[%s2707_s1 + $0xb8] sm:$0xff]  ;;  %p2137_p3 = por %p2136_p2, %p2135_p1 }
   0xd   :  { %1964 = vmatprep.subr.bf16.mxu1 %v2154_v3  ;;  %1975 = vmatpush3.bf16.msra.mxu0 %v1974_v24  ;;  %v1986_v41 = vpack.c.bf16 %v280_v39, %v279_v38  ;;  %v1989_v43 = vpack.c.bf16 %v282_v42, %v281_v40  ;;  %v283_v44 = vld [vmem:[%s2707_s1 + $0xc0] sm:$0xff]  ;;  %v284_v45 = vld [vmem:[%s2707_s1 + $0xc8] sm:$0xff]  ;;  %v285_v52 = vld [vmem:[%s2707_s1 + $0xd0] sm:$0xff] }
   0xe   :  { %1976 = vmatprep.subr.bf16.mxu0 %v2154_v3  ;;  %v1992_v46 = vpack.c.bf16 %v284_v45, %v283_v44  ;;  %v1429_v47 = vld [vmem:[%s2708_s2 + $0x1] ss:$0 sm:$0xff]  ;;  %v286_v53 = vld [vmem:[%s2707_s1 + $0xd8] sm:$0xff]  ;;  %v1436_v56 = vld [vmem:[%s2707_s1 + $0xe8] sm:$0xff]  ;;  %p2138_p4 = pnand %p2137_p3, %p2131_p0 }
   0xf   :  { %v1995_v54 = vpack.c.bf16 %v286_v53, %v285_v52  ;;  %v1435_v55 = vld [vmem:[%s2707_s1 + $0xe0] sm:$0xff]  ;;  %v1437_v0 = vld [vmem:[%s2707_s1 + $0xf0] sm:$0xff]  ;;  %v1438_v1 = vld [vmem:[%s2707_s1 + $0xf8] sm:$0xff] }
  0x10   :  { %1966 = vmatpush3.bf16.msra.mxu1 %v1965_v14  ;;  %v1998_v58 = vpack.c.bf16 %v1436_v56, %v1435_v55  ;;  %v1431_v59 = vld [vmem:[%s2708_s2 + $0x2] ss:$0 sm:$0xff]  ;;  %v2001_v2 = vpack.c.bf16 %v1438_v1, %v1437_v0  ;;  %v1433_v4 = vld [vmem:[%s2708_s2 + $0x3] ss:$0 sm:$0xff]  ;;  %v1443_v7 = vld [vmem:[%s2707_s1 + $0x108] sm:$0xff] }
  0x11   :  { %1967 = vmatprep.subr.bf16.mxu1 %v2154_v3  ;;  %1978 = vmatpush3.bf16.msra.mxu0 %v1977_v26  ;;  %v1442_v5 = vld [vmem:[%s2707_s1 + $0x100] sm:$0xff]  ;;  %v1444_v14 = vld [vmem:[%s2707_s1 + $0x110] sm:$0xff]  ;;  %v1445_v15 = vld [vmem:[%s2707_s1 + $0x118] sm:$0xff] }
  0x12   :  { %1979 = vmatprep.subr.bf16.mxu0 %v2154_v3  ;;  %v2004_v12 = vpack.c.bf16 %v1443_v7, %v1442_v5  ;;  %v2007_v16 = vpack.c.bf16 %v1445_v15, %v1444_v14  ;;  %v1448_v19 = vld [vmem:[%s2707_s1 + $0x130] sm:$0xff]  ;;  %v1453_v22 = vld [vmem:[%s2707_s1 + $0x140] sm:$0xff]  ;;  %v1454_v23 = vld [vmem:[%s2707_s1 + $0x148] sm:$0xff] }
  0x13   :  { %v1455_v24 = vld [vmem:[%s2707_s1 + $0x150] sm:$0xff]  ;;  %v2016_v25 = vpack.c.bf16 %v1454_v23, %v1453_v22  ;;  %v1456_v26 = vld [vmem:[%s2707_s1 + $0x158] sm:$0xff]  ;;  %v1457_v28 = vld [vmem:[%s2707_s1 + $0x160] sm:$0xff] }
  0x14   :  { %1969 = vmatpush3.bf16.msra.mxu1 %v1968_v17  ;;  %v1447_v17 = vld [vmem:[%s2707_s1 + $0x128] sm:$0xff]  ;;  %v2019_v27 = vpack.c.bf16 %v1456_v26, %v1455_v24  ;;  %v1459_v36 = vld [vmem:[%s2707_s1 + $0x170] sm:$0xff]  ;;  %v1464_v39 = vld [vmem:[%s2707_s1 + $0x180] sm:$0xff] }
  0x15   :  { %1970 = vmatprep.subr.bf16.mxu1 %v2154_v3  ;;  %1981 = vmatpush3.bf16.msra.mxu0 %v1980_v29  ;;  %v1458_v29 = vld [vmem:[%s2707_s1 + $0x168] sm:$0xff]  ;;  %v1468_v45 = vld [vmem:[%s2707_s1 + $0x1a0] sm:$0xff]  ;;  %v1470_v53 = vld [vmem:[%s2707_s1 + $0x1b0] sm:$0xff] }
  0x16   :  { %1982 = vmatprep.subr.bf16.mxu0 %v2154_v3  ;;  %v1465_v40 = vld [vmem:[%s2707_s1 + $0x188] sm:$0xff]  ;;  %v1475_v56 = vld [vmem:[%s2707_s1 + $0x1c0] sm:$0xff]  ;;  %v1477_v0 = vld [vmem:[%s2707_s1 + $0x1d0] sm:$0xff] }
  0x17   :  { %v2028_v42 = vpack.c.bf16 %v1465_v40, %v1464_v39  ;;  %v1476_v57 = vld [vmem:[%s2707_s1 + $0x1c8] sm:$0xff]  ;;  %v1478_v1 = vld [vmem:[%s2707_s1 + $0x1d8] sm:$0xff]  ;;  %v1473_v5 = vld [vmem:[%s2708_s2 + $0x7] ss:$0 sm:$0xff] }
  0x18   :  { %1972 = vmatpush3.bf16.msra.mxu1 %v1971_v20  ;;  %v1449_v20 = vld [vmem:[%s2707_s1 + $0x138] sm:$0xff]  ;;  %v1482_v7 = vld [vmem:[%s2707_s1 + $0x1e0] sm:$0xff]  ;;  %v1488_v22 = vld [vmem:[%s2707_s1 + $0x210] sm:$0xff] }
  0x19   :  { %1985 = vmatprep.subr.bf16.mxu1 %v2154_v3  ;;  %1984 = vmatpush3.bf16.msra.mxu0 %v1983_v37  ;;  %v2013_v21 = vpack.c.bf16 %v1449_v20, %v1448_v19  ;;  %v1460_v37 = vld [vmem:[%s2707_s1 + $0x178] sm:$0xff]  ;;  %v1487_v20 = vld [vmem:[%s2707_s1 + $0x208] sm:$0xff]  ;;  %v1499_v39 = vld [vmem:[%s2707_s1 + $0x250] sm:$0xff] }
  0x1a   :  { %1997 = vmatprep.subr.bf16.mxu0 %v2154_v3  ;;  %v2025_v38 = vpack.c.bf16 %v1460_v37, %v1459_v36  ;;  %v1485_v19 = vld [vmem:[%s2707_s1 + $0x1f8] sm:$0xff]  ;;  %v1494_v26 = vld [vmem:[%s2707_s1 + $0x228] sm:$0xff] }
  0x1b   :  { %v1489_v23 = vld [vmem:[%s2707_s1 + $0x218] sm:$0xff] }
  0x1c   :  { %v2055_v24 = vpack.c.bf16 %v1489_v23, %v1488_v22  ;;  %v1500_v40 = vld [vmem:[%s2707_s1 + $0x258] sm:$0xff]  ;;  %v1528_v23 = vld [vmem:[%s2707_s1 + $0x2f0] sm:$0xff] }
  0xde   :  { %v99_v31 = vpop.f32.mrb[0].mxu1 }
  0xdf   :  { %v100_v32 = vadd.f32 %v1427_v30, %v99_v31  ;;  %v1693_v33 = vpop.f32.mrb[1].mxu1  ;;  %v2022_v30 = vpack.c.bf16 %v1458_v29, %v1457_v28  ;;  %v1440_v31 = vld [vmem:[%s2708_s2 + $0x4] ss:$0 sm:$0xff]  ;;  %v1496_v29 = vld [vmem:[%s2707_s1 + $0x238] sm:$0xff] }
  0xe1   :  { %v103_v34 = vmax.f32 %v100_v32, 0.0 }
  0xe3   :  { %1711 = vmatmul.mubr.msk.f32.vlgmr.msra.gmra.mrb[2].mxu1 %vm117_vm2, %v103_v34 }
  0xe4   :  { %1748 = vmatprep.mubr.msk.f32.mxu1 %vm2155_vm0, %v2156_v6  ;;  %1987 = vmatpush3.bf16.msra.mxu1 %v1986_v41  ;;  %v1466_v41 = vld [vmem:[%s2707_s1 + $0x190] sm:$0xff] }
  0xe5   :  { %1988 = vmatprep.subr.bf16.mxu1 %v2154_v3 }
  0xe8   :  { %1990 = vmatpush3.bf16.msra.mxu1 %v1989_v43  ;;  %v1467_v43 = vld [vmem:[%s2707_s1 + $0x198] sm:$0xff] }
  0xe9   :  { %1991 = vmatprep.subr.bf16.mxu1 %v2154_v3  ;;  %v2031_v44 = vpack.c.bf16 %v1467_v43, %v1466_v41  ;;  %v2067_v41 = vpack.c.bf16 %v1500_v40, %v1499_v39  ;;  %v1505_v43 = vld [vmem:[%s2707_s1 + $0x268] sm:$0xff]  ;;  %v1539_v40 = vld [vmem:[%s2707_s1 + $0x330] sm:$0xff] }
  0xec   :  { %1993 = vmatpush3.bf16.msra.mxu1 %v1992_v46  ;;  %v1469_v46 = vld [vmem:[%s2707_s1 + $0x1a8] sm:$0xff] }
  0xed   :  { %1994 = vmatprep.subr.bf16.mxu1 %v2154_v3 }
  0xf0   :  { %1996 = vmatpush3.bf16.msra.mxu1 %v1995_v54  ;;  %v1471_v54 = vld [vmem:[%s2707_s1 + $0x1b8] sm:$0xff] }
  0xf1   :  { %2015 = vmatprep.subr.bf16.mxu1 %v2154_v3  ;;  %v2037_v55 = vpack.c.bf16 %v1471_v54, %v1470_v53 }
 0x1b6   :  { %v187_v48 = vpop.f32.mrb[2].mxu1 }
 0x1b7   :  { %v188_v49 = vadd.f32 %v1429_v47, %v187_v48  ;;  %v1712_v50 = vpop.f32.mrb[3].mxu1  ;;  %v2034_v47 = vpack.c.bf16 %v1469_v46, %v1468_v45  ;;  %v1451_v48 = vld [vmem:[%s2708_s2 + $0x5] ss:$0 sm:$0xff]  ;;  %v1507_v46 = vld [vmem:[%s2707_s1 + $0x278] sm:$0xff] }
 0x1b9   :  { %v191_v51 = vmax.f32 %v188_v49, 0.0 }
 0x1bb   :  { %1730 = vmatmul.mubr.msk.f32.vlgmr.msra.gmra.mrb[0].mxu0 %vm117_vm2, %v191_v51 }
 0x1bc   :  { %1759 = vmatprep.mubr.msk.f32.mxu0 %vm2155_vm0, %v2156_v6  ;;  %1999 = vmatpush3.bf16.msra.mxu0 %v1998_v58  ;;  %v2040_v58 = vpack.c.bf16 %v1476_v57, %v1475_v56  ;;  %v1510_v56 = vld [vmem:[%s2707_s1 + $0x290] sm:$0xff]  ;;  %v1511_v57 = vld [vmem:[%s2707_s1 + $0x298] sm:$0xff] }
 0x1bd   :  { %2000 = vmatprep.subr.bf16.mxu0 %v2154_v3 }
 0x1c0   :  { %2002 = vmatpush3.bf16.msra.mxu0 %v2001_v2  ;;  %v2043_v2 = vpack.c.bf16 %v1478_v1, %v1477_v0 }
 0x1c1   :  { %2003 = vmatprep.subr.bf16.mxu0 %v2154_v3 }
 0x28e   :  { %v274_v60 = vpop.f32.mrb[0].mxu0 }
 0x28f   :  { %v275_v61 = vadd.f32 %v1431_v59, %v274_v60  ;;  %v1731_v62 = vpop.f32.mrb[1].mxu0  ;;  %v1462_v59 = vld [vmem:[%s2708_s2 + $0x6] ss:$0 sm:$0xff] }
 0x291   :  { %v278_v63 = vmax.f32 %v275_v61, 0.0 }
 0x293   :  { %1749 = vmatmul.mubr.msk.f32.vlgmr.msra.gmra.mrb[4].mxu1 %vm117_vm2, %v278_v63 }
 0x294   :  { %1797 = vmatprep.mubr.msk.f32.mxu1 %vm2155_vm0, %v2156_v6  ;;  %2017 = vmatpush3.bf16.msra.mxu1 %v2016_v25  ;;  %v1493_v25 = vld [vmem:[%s2707_s1 + $0x220] sm:$0xff] }
 0x295   :  { %2018 = vmatprep.subr.bf16.mxu1 %v2154_v3  ;;  %v2058_v28 = vpack.c.bf16 %v1494_v26, %v1493_v25  ;;  %v1533_v26 = vld [vmem:[%s2707_s1 + $0x300] sm:$0xff] }
 0x298   :  { %2020 = vmatpush3.bf16.msra.mxu1 %v2019_v27  ;;  %v1495_v27 = vld [vmem:[%s2707_s1 + $0x230] sm:$0xff] }
 0x299   :  { %2021 = vmatprep.subr.bf16.mxu1 %v2154_v3 }
 0x29c   :  { %2023 = vmatpush3.bf16.msra.mxu1 %v2022_v30  ;;  %v2061_v30 = vpack.c.bf16 %v1496_v29, %v1495_v27  ;;  %v1534_v27 = vld [vmem:[%s2707_s1 + $0x308] sm:$0xff] }
 0x29d   :  { %2024 = vmatprep.subr.bf16.mxu1 %v2154_v3  ;;  %v2100_v29 = vpack.c.bf16 %v1534_v27, %v1533_v26 }
 0x2a0   :  { %2026 = vmatpush3.bf16.msra.mxu1 %v2025_v38 }
 0x2a1   :  { %2039 = vmatprep.subr.bf16.mxu1 %v2154_v3 }
 0x366   :  { %v361_v8 = vpop.f32.mrb[4].mxu1 }
 0x367   :  { %v2335_v9 = vadd.f32 %v1433_v4, %v361_v8  ;;  %v1750_v11 = vpop.f32.mrb[5].mxu1  ;;  %v19_v4 = vpop.permute.xlu0 %18  ;;  %v1483_v8 = vld [vmem:[%s2707_s1 + $0x1e8] sm:$0xff] }
 0x369   :  { %v2339_v13 = vsub.f32 %v2208_v10, %v2335_v9  ;;  %v1446_v10 = vld [vmem:[%s2707_s1 + $0x120] sm:$0xff] }
 0x36a   :  { %v2010_v18 = vpack.c.bf16 %v1447_v17, %v1446_v10 }
 0x36b   :  { %1760 = vmatmul.mubr.msk.f32.vlgmr.msra.gmra.mrb[2].mxu0 %vm30_vm1, %v2339_v13 }
 0x36c   :  { %2005 = vmatpush3.bf16.msra.mxu0 %v2004_v12  ;;  %1778 = vmatprep.mubr.msk.f32.mxu0 %vm2155_vm0, %v2156_v6  ;;  %v366_v12 = vadd.f32 %v2335_v9, %v19_v4  ;;  %v1517_v4 = vld [vmem:[%s2707_s1 + $0x2b0] sm:$0xff] }
 0x36d   :  { %2006 = vmatprep.subr.bf16.mxu0 %v2154_v3 }
 0x370   :  { %2008 = vmatpush3.bf16.msra.mxu0 %v2007_v16  ;;  %v2046_v16 = vpack.c.bf16 %v1483_v8, %v1482_v7  ;;  %v1513_v8 = vld [vmem:[%s2708_s2 + $0xb] ss:$0 sm:$0xff] }
 0x371   :  { %2009 = vmatprep.subr.bf16.mxu0 %v2154_v3 }
 0x374   :  { %2011 = vmatpush3.bf16.msra.mxu0 %v2010_v18  ;;  %v1484_v18 = vld [vmem:[%s2707_s1 + $0x1f0] sm:$0xff] }
 0x375   :  { %2012 = vmatprep.subr.bf16.mxu0 %v2154_v3  ;;  %v2049_v9 = vpack.c.bf16 %v1485_v19, %v1484_v18 }
 0x378   :  { %2014 = vmatpush3.bf16.msra.mxu0 %v2013_v21 }
 0x379   :  { %2027 = vmatprep.subr.bf16.mxu0 %v2154_v3 }
 0x43e   :  { %v447_v32 = vpop.f32.mrb[2].mxu0 }
 0x43f   :  { %v448_v33 = vadd.f32 %v1440_v31, %v447_v32  ;;  %v1761_v34 = vpop.f32.mrb[3].mxu0  ;;  %v1497_v31 = vld [vmem:[%s2707_s1 + $0x240] sm:$0xff]  ;;  %v1498_v32 = vld [vmem:[%s2707_s1 + $0x248] sm:$0xff] }
 0x440   :  { %v1480_v34 = vld [vmem:[%s2708_s2 + $0x8] ss:$0 sm:$0xff] }
 0x441   :  { %v451_v35 = vmax.f32 %v448_v33, 0.0  ;;  %v2064_v33 = vpack.c.bf16 %v1498_v32, %v1497_v31  ;;  %v1537_v32 = vld [vmem:[%s2707_s1 + $0x320] sm:$0xff] }
 0x443   :  { %1779 = vmatmul.mubr.msk.f32.vlgmr.msra.gmra.mrb[4].mxu0 %vm117_vm2, %v451_v35 }
 0x444   :  { %1816 = vmatprep.mubr.msk.f32.mxu0 %vm2155_vm0, %v2156_v6  ;;  %2029 = vmatpush3.bf16.msra.mxu0 %v2028_v42  ;;  %v1504_v42 = vld [vmem:[%s2707_s1 + $0x260] sm:$0xff] }
 0x445   :  { %2030 = vmatprep.subr.bf16.mxu0 %v2154_v3  ;;  %v2070_v45 = vpack.c.bf16 %v1505_v43, %v1504_v42  ;;  %v1544_v43 = vld [vmem:[%s2707_s1 + $0x340] sm:$0xff] }
 0x448   :  { %2032 = vmatpush3.bf16.msra.mxu0 %v2031_v44  ;;  %v1506_v44 = vld [vmem:[%s2707_s1 + $0x270] sm:$0xff] }
 0x449   :  { %2033 = vmatprep.subr.bf16.mxu0 %v2154_v3 }
 0x44c   :  { %2035 = vmatpush3.bf16.msra.mxu0 %v2034_v47  ;;  %v2073_v47 = vpack.c.bf16 %v1507_v46, %v1506_v44  ;;  %v1545_v44 = vld [vmem:[%s2707_s1 + $0x348] sm:$0xff]  ;;  %v1547_v46 = vld [vmem:[%s2707_s1 + $0x358] sm:$0xff] }
 0x44d   :  { %2036 = vmatprep.subr.bf16.mxu0 %v2154_v3 }
 0x450   :  { %2038 = vmatpush3.bf16.msra.mxu0 %v2037_v55 }
 0x451   :  { %2057 = vmatprep.subr.bf16.mxu0 %v2154_v3 }
 0x516   :  { %v534_v49 = vpop.f32.mrb[4].mxu0 }
 0x517   :  { %v535_v50 = vadd.f32 %v1451_v48, %v534_v49  ;;  %v1780_v51 = vpop.f32.mrb[5].mxu0  ;;  %v1508_v48 = vld [vmem:[%s2707_s1 + $0x280] sm:$0xff]  ;;  %v1509_v49 = vld [vmem:[%s2707_s1 + $0x288] sm:$0xff] }
 0x518   :  { %v1491_v51 = vld [vmem:[%s2708_s2 + $0x9] ss:$0 sm:$0xff] }
 0x519   :  { %v538_v52 = vmax.f32 %v535_v50, 0.0  ;;  %v2076_v50 = vpack.c.bf16 %v1509_v49, %v1508_v48  ;;  %v1548_v48 = vld [vmem:[%s2707_s1 + $0x360] sm:$0xff]  ;;  %v1549_v49 = vld [vmem:[%s2707_s1 + $0x368] sm:$0xff] }
 0x51b   :  { %1798 = vmatmul.mubr.msk.f32.vlgmr.msra.gmra.mrb[6].mxu1 %vm117_vm2, %v538_v52 }
 0x51c   :  { %1827 = vmatprep.mubr.msk.f32.mxu1 %vm2155_vm0, %v2156_v6  ;;  %2041 = vmatpush3.bf16.msra.mxu1 %v2040_v58  ;;  %v2079_v58 = vpack.c.bf16 %v1511_v57, %v1510_v56  ;;  %v1550_v56 = vld [vmem:[%s2707_s1 + $0x370] sm:$0xff]  ;;  %v1551_v57 = vld [vmem:[%s2707_s1 + $0x378] sm:$0xff] }
 0x51d   :  { %2042 = vmatprep.subr.bf16.mxu1 %v2154_v3 }
 0x520   :  { %2044 = vmatpush3.bf16.msra.mxu1 %v2043_v2 }
 0x521   :  { %2045 = vmatprep.subr.bf16.mxu1 %v2154_v3 }
 0x5ee   :  { %v621_v60 = vpop.f32.mrb[6].mxu1 }
 0x5ef   :  { %v622_v61 = vadd.f32 %v1462_v59, %v621_v60  ;;  %v1799_v62 = vpop.f32.mrb[7].mxu1  ;;  %v1515_v59 = vld [vmem:[%s2707_s1 + $0x2a0] sm:$0xff]  ;;  %v1516_v60 = vld [vmem:[%s2707_s1 + $0x2a8] sm:$0xff] }
 0x5f0   :  { %v1502_v62 = vld [vmem:[%s2708_s2 + $0xa] ss:$0 sm:$0xff] }
 0x5f1   :  { %v625_v63 = vmax.f32 %v622_v61, 0.0  ;;  %v2082_v61 = vpack.c.bf16 %v1516_v60, %v1515_v59 }
 0x5f3   :  { %1817 = vmatmul.mubr.msk.f32.vlgmr.msra.gmra.mrb[6].mxu0 %vm117_vm2, %v625_v63 }
 0x5f4   :  { %1865 = vmatprep.mubr.msk.f32.mxu0 %vm2155_vm0, %v2156_v6  ;;  %2059 = vmatpush3.bf16.msra.mxu0 %v2058_v28  ;;  %v1535_v28 = vld [vmem:[%s2707_s1 + $0x310] sm:$0xff] }
 0x5f5   :  { %2060 = vmatprep.subr.bf16.mxu0 %v2154_v3 }
 0x5f8   :  { %2062 = vmatpush3.bf16.msra.mxu0 %v2061_v30  ;;  %v1536_v30 = vld [vmem:[%s2707_s1 + $0x318] sm:$0xff] }
 0x5f9   :  { %2063 = vmatprep.subr.bf16.mxu0 %v2154_v3  ;;  %v2103_v31 = vpack.c.bf16 %v1536_v30, %v1535_v28 }
 0x5fc   :  { %2065 = vmatpush3.bf16.msra.mxu0 %v2064_v33  ;;  %v1538_v33 = vld [vmem:[%s2707_s1 + $0x328] sm:$0xff] }
 0x5fd   :  { %2066 = vmatprep.subr.bf16.mxu0 %v2154_v3 }
 0x600   :  { %2068 = vmatpush3.bf16.msra.mxu0 %v2067_v41  ;;  %v1540_v41 = vld [vmem:[%s2707_s1 + $0x338] sm:$0xff] }
 0x601   :  { %2081 = vmatprep.subr.bf16.mxu0 %v2154_v3  ;;  %v2109_v42 = vpack.c.bf16 %v1540_v41, %v1539_v40 }
 0x6c6   :  { %v708_v11 = vpop.f32.mrb[6].mxu0 }
 0x6c7   :  { %v709_v14 = vadd.f32 %v1473_v5, %v708_v11  ;;  %v1818_v15 = vpop.f32.mrb[7].mxu0  ;;  %v1518_v5 = vld [vmem:[%s2707_s1 + $0x2b8] sm:$0xff]  ;;  %v1522_v11 = vld [vmem:[%s2707_s1 + $0x2c0] sm:$0xff] }
 0x6c8   :  { %v2085_v7 = vpack.c.bf16 %v1518_v5, %v1517_v4 }
 0x6c9   :  { %v2466_v10 = vsub.f32 %v2339_v13, %v709_v14  ;;  %v2468_v17 = vadd.f32 %v709_v14, %v366_v12  ;;  %v1486_v13 = vld [vmem:[%s2707_s1 + $0x200] sm:$0xff]  ;;  %v1523_v12 = vld [vmem:[%s2707_s1 + $0x2c8] sm:$0xff] }
 0x6ca   :  { %v2052_v21 = vpack.c.bf16 %v1487_v20, %v1486_v13  ;;  %v2088_v18 = vpack.c.bf16 %v1523_v12, %v1522_v11  ;;  %v1524_v13 = vld [vmem:[%s2707_s1 + $0x2d0] sm:$0xff]  ;;  %v1525_v20 = vld [vmem:[%s2707_s1 + $0x2d8] sm:$0xff] }
 0x6cb   :  { %1828 = vmatmul.mubr.msk.f32.vlgmr.msra.gmra.mrb[8].mxu1 %vm30_vm1, %v2466_v10 }
 0x6cc   :  { %2047 = vmatpush3.bf16.msra.mxu1 %v2046_v16  ;;  %1846 = vmatprep.mubr.msk.f32.mxu1 %vm2155_vm0, %v2156_v6 }
 0x6cd   :  { %2048 = vmatprep.subr.bf16.mxu1 %v2154_v3 }
 0x6d0   :  { %2050 = vmatpush3.bf16.msra.mxu1 %v2049_v9 }
 0x6d1   :  { %2051 = vmatprep.subr.bf16.mxu1 %v2154_v3 }
 0x6d4   :  { %2053 = vmatpush3.bf16.msra.mxu1 %v2052_v21  ;;  %v2091_v21 = vpack.c.bf16 %v1525_v20, %v1524_v13 }
 0x6d5   :  { %2054 = vmatprep.subr.bf16.mxu1 %v2154_v3 }
 0x6d8   :  { %2056 = vmatpush3.bf16.msra.mxu1 %v2055_v24  ;;  %v1529_v24 = vld [vmem:[%s2707_s1 + $0x2f8] sm:$0xff] }
 0x6d9   :  { %2069 = vmatprep.subr.bf16.mxu1 %v2154_v3  ;;  %v2097_v25 = vpack.c.bf16 %v1529_v24, %v1528_v23 }
 0x79e   :  { %v794_v35 = vpop.f32.mrb[8].mxu1 }
 0x79f   :  { %v795_v36 = vadd.f32 %v1480_v34, %v794_v35  ;;  %v1829_v37 = vpop.f32.mrb[9].mxu1  ;;  %v2106_v34 = vpack.c.bf16 %v1538_v33, %v1537_v32  ;;  %v1520_v35 = vld [vmem:[%s2708_s2 + $0xc] ss:$0 sm:$0xff] }
 0x7a1   :  { %v798_v38 = vmax.f32 %v795_v36, 0.0 }
 0x7a3   :  { %1847 = vmatmul.mubr.msk.f32.vlgmr.msra.gmra.mrb[10].mxu1 %vm117_vm2, %v798_v38 }
 0x7a4   :  { %1884 = vmatprep.mubr.msk.f32.mxu1 %vm2155_vm0, %v2156_v6  ;;  %2071 = vmatpush3.bf16.msra.mxu1 %v2070_v45  ;;  %v2112_v45 = vpack.c.bf16 %v1545_v44, %v1544_v43 }
 0x7a5   :  { %2072 = vmatprep.subr.bf16.mxu1 %v2154_v3 }
 0x7a8   :  { %2074 = vmatpush3.bf16.msra.mxu1 %v2073_v47 }
 0x7a9   :  { %2075 = vmatprep.subr.bf16.mxu1 %v2154_v3 }
 0x7ac   :  { %2077 = vmatpush3.bf16.msra.mxu1 %v2076_v50  ;;  %v2118_v50 = vpack.c.bf16 %v1549_v49, %v1548_v48 }
 0x7ad   :  { %2078 = vmatprep.subr.bf16.mxu1 %v2154_v3 }
 0x7b0   :  { %2080 = vmatpush3.bf16.msra.mxu1 %v2079_v58  ;;  %v2121_v58 = vpack.c.bf16 %v1551_v57, %v1550_v56 }
 0x7b1   :  { %2099 = vmatprep.subr.bf16.mxu1 %v2154_v3 }
 0x876   :  { %v881_v52 = vpop.f32.mrb[10].mxu1 }
 0x877   :  { %v882_v53 = vadd.f32 %v1491_v51, %v881_v52  ;;  %v1848_v54 = vpop.f32.mrb[11].mxu1  ;;  %v1531_v51 = vld [vmem:[%s2708_s2 + $0xd] ss:$0 sm:$0xff] }
 0x879   :  { %v885_v55 = vmax.f32 %v882_v53, 0.0 }
 0x87b   :  { %1866 = vmatmul.mubr.msk.f32.vlgmr.msra.gmra.mrb[8].mxu0 %vm117_vm2, %v885_v55 }
 0x87c   :  { %1895 = vmatprep.mubr.msk.f32.mxu0 %vm2155_vm0, %v2156_v6  ;;  %2083 = vmatpush3.bf16.msra.mxu0 %v2082_v61 }
 0x87d   :  { %2084 = vmatprep.subr.bf16.mxu0 %v2154_v3 }
 0x880   :  { %2086 = vmatpush3.bf16.msra.mxu0 %v2085_v7 }
 0x881   :  { %2087 = vmatprep.subr.bf16.mxu0 %v2154_v3 }
 0x94e   :  { %v968_v63 = vpop.f32.mrb[8].mxu0 }
 0x94f   :  { %v969_v0 = vadd.f32 %v1502_v62, %v968_v63  ;;  %v1867_v1 = vpop.f32.mrb[9].mxu0  ;;  %v1553_v63 = vld [vmem:[%s2708_s2 + $0xf] ss:$0 sm:$0xff] }
 0x951   :  { %v972_v2 = vmax.f32 %v969_v0, 0.0 }
 0x953   :  { %1885 = vmatmul.mubr.msk.f32.vlgmr.msra.gmra.mrb[12].mxu1 %vm117_vm2, %v972_v2 }
 0x954   :  { %1933 = vmatprep.mubr.msk.f32.mxu1 %vm2155_vm0, %v2156_v6  ;;  %2101 = vmatpush3.bf16.msra.mxu1 %v2100_v29 }
 0x955   :  { %2102 = vmatprep.subr.bf16.mxu1 %v2154_v3 }
 0x958   :  { %2104 = vmatpush3.bf16.msra.mxu1 %v2103_v31 }
 0x959   :  { %2105 = vmatprep.subr.bf16.mxu1 %v2154_v3 }
 0x95c   :  { %2107 = vmatpush3.bf16.msra.mxu1 %v2106_v34 }
 0x95d   :  { %2108 = vmatprep.subr.bf16.mxu1 %v2154_v3 }
 0x960   :  { %2110 = vmatpush3.bf16.msra.mxu1 %v2109_v42 }
 0xa26   :  { %v1055_v14 = vpop.f32.mrb[12].mxu1 }
 0xa27   :  { %v1056_v15 = vadd.f32 %v1513_v8, %v1055_v14  ;;  %v1886_v16 = vpop.f32.mrb[13].mxu1 }
 0xa29   :  { %v1059_v19 = vsub.f32 %v2466_v10, %v1056_v15  ;;  %v2595_v9 = vadd.f32 %v1056_v15, %v2468_v17  ;;  %v1526_v10 = vld [vmem:[%s2707_s1 + $0x2e0] sm:$0xff]  ;;  %v1527_v17 = vld [vmem:[%s2707_s1 + $0x2e8] sm:$0xff] }
 0xa2a   :  { %v2094_v22 = vpack.c.bf16 %v1527_v17, %v1526_v10 }
 0xa2b   :  { %1896 = vmatmul.mubr.msk.f32.vlgmr.msra.gmra.mrb[10].mxu0 %vm30_vm1, %v1059_v19 }
 0xa2c   :  { %2089 = vmatpush3.bf16.msra.mxu0 %v2088_v18  ;;  %1914 = vmatprep.mubr.msk.f32.mxu0 %vm2155_vm0, %v2156_v6 }
 0xa2d   :  { %2090 = vmatprep.subr.bf16.mxu0 %v2154_v3 }
 0xa30   :  { %2092 = vmatpush3.bf16.msra.mxu0 %v2091_v21 }
 0xa31   :  { %2093 = vmatprep.subr.bf16.mxu0 %v2154_v3 }
 0xa34   :  { %2095 = vmatpush3.bf16.msra.mxu0 %v2094_v22 }
 0xa35   :  { %2096 = vmatprep.subr.bf16.mxu0 %v2154_v3 }
 0xa38   :  { %2098 = vmatpush3.bf16.msra.mxu0 %v2097_v25 }
 0xa39   :  { %2111 = vmatprep.subr.bf16.mxu0 %v2154_v3 }
 0xafe   :  { %v1141_v36 = vpop.f32.mrb[10].mxu0 }
 0xaff   :  { %v1142_v37 = vadd.f32 %v1520_v35, %v1141_v36  ;;  %v1897_v38 = vpop.f32.mrb[11].mxu0 }
 0xb01   :  { %v1145_v39 = vmax.f32 %v1142_v37, 0.0 }
 0xb03   :  { %1915 = vmatmul.mubr.msk.f32.vlgmr.msra.gmra.mrb[12].mxu0 %vm117_vm2, %v1145_v39 }
 0xb04   :  { %1952 = vmatprep.mubr.msk.f32.mxu0 %vm2155_vm0, %v2156_v6  ;;  %v1546_v6 = vld [vmem:[%s2707_s1 + $0x350] sm:$0xff]  ;;  %2113 = vmatpush3.bf16.msra.mxu0 %v2112_v45  ;;  %s2158_s1 = smov 96  }
 0xb05   :  { %v2115_v47 = vpack.c.bf16 %v1547_v46, %v1546_v6  ;;  %2114 = vmatprep.subr.bf16.mxu0 %v2154_v3 }
 0xb08   :  { %2116 = vmatpush3.bf16.msra.mxu0 %v2115_v47 }
 0xb09   :  { %2117 = vmatprep.subr.bf16.mxu0 %v2154_v3 }
 0xb0c   :  { %2119 = vmatpush3.bf16.msra.mxu0 %v2118_v50 }
 0xb0d   :  { %2120 = vmatprep.subr.bf16.mxu0 %v2154_v3  ;;  %v1542_v3 = vld [vmem:[%s2708_s2 + $0xe] ss:$0 sm:$0xff] }
 0xb10   :  { %2122 = vmatpush3.bf16.msra.mxu0 %v2121_v58 }
 0xbd6   :  { %v1228_v52 = vpop.f32.mrb[12].mxu0 }
 0xbd7   :  { %v1229_v53 = vadd.f32 %v1531_v51, %v1228_v52  ;;  %v1916_v54 = vpop.f32.mrb[13].mxu0 }
 0xbd9   :  { %v1232_v55 = vmax.f32 %v1229_v53, 0.0 }
 0xbdb   :  { %1934 = vmatmul.mubr.msk.f32.vlgmr.msra.gmra.mrb[14].mxu1 %vm117_vm2, %v1232_v55 }
 0xcae   :  { %v1315_v59 = vpop.f32.mrb[14].mxu1 }
 0xcaf   :  { %v1316_v60 = vadd.f32 %v1542_v3, %v1315_v59  ;;  %v1935_v61 = vpop.f32.mrb[15].mxu1 }
 0xcb1   :  { %v1319_v62 = vmax.f32 %v1316_v60, 0.0 }
 0xcb3   :  { %1953 = vmatmul.mubr.msk.f32.vlgmr.msra.gmra.mrb[14].mxu0 %vm117_vm2, %v1319_v62 }
 0xd86   :  { %v1402_v0 = vpop.f32.mrb[14].mxu0 }
 0xd87   :  { %v1403_v1 = vadd.f32 %v1553_v63, %v1402_v0  ;;  %v1954_v2 = vpop.f32.mrb[15].mxu0 }
 0xd89   :  { %v1406_v4 = vadd.f32 %v1403_v1, %v2595_v9 }
 0xd8b   :  { %1408 = vrot.lane.b32.xlu0 %v1406_v4, %s2158_s1 }
 0xdfd   :  { %v1409_v5 = vpop.permute.xlu0 %1408 }
 0xdfe   :  { %1412 = vst.msk [vmem:[#allocation2] sm:$0xff] %vm1411_vm3, %v1409_v5 }
 0xdff   :  { %2141 = shalt.err (!%p2138_p4)
}
 0xe00   :  { %s2142_s22 = scalar_lea.hbm %s2709_s3, 128 }
 0xe01   :  { %p2143_p5 = scmp.ne.s32.totalorder %s2709_s3, %s2142_s22  ;;  %p2146_p6 = scmp.lt.u32.totalorder %s2142_s22, %s2709_s3 }
 0xe03   :  { %p2148_p7 = pnand %p2146_p6, %p2143_p5 }
 0xe05   :  { %2151 = shalt.err (!%p2148_p7)
}
 0xe06   :  { %1422 = dma.vmem_to_hbm [thread:$0]  %s1420_s19, 128, %s2709_s3, [#allocation3]  }
 0xe07   :  { %2152 = dma.done.wait [#allocation3], 128  }
 0xe08   :  { %2153 = vsyncadd [#allocation3], 4294967168 }
 0xe09   :  { %1426 = vsyncpa [#allocation3], 1 }

</bundles_post_ra>
